<compile_context>
chip_gen: v7x
topology: tpu7x:2x2x1
jax: 0.10.0
libtpu: 0.0.40
codegen_flags: <defaults>
</compile_context>

<pallas_src>
import jax
import jax.numpy as jnp
from jax.experimental import pallas as pl
from jax.experimental.pallas import tpu as pltpu

IN_DIM = 12            # real input features
IN_PAD = 16            # input feature rows shipped from HBM (sublane aligned)
FEAT = 64              # padded feature width used for hidden layers
CONST_IN = 12          # row of the padded *input* that holds the constant 1.0
CONST_HID = 56         # rows [56,64) of hidden activations hold the constant 1.0
MAX_TB = 1024          # max batch tile (lanes)

# true layer widths of the PyTorch module: (fan_in, fan_out)
LAYER_DIMS = [(12, 48), (48, 48), (48, 24), (24, 24), (24, 24), (24, 1)]
NUM_LAYERS = len(LAYER_DIMS)


def _round_up(n, m):
    return ((n + m - 1) // m) * m


def _mlp_kernel(x_ref, w_ref, o_ref):
    """Fused MLP forward for one batch tile (feature-major layout)."""
    x = x_ref[...].astype(jnp.float32)                      # (16, tb)

    # Layer 0: direct K=16 contraction on the shipped rows (bias folded at
    # column CONST_IN=12 < 16; rows [CONST_HID,64) regenerate the constant 1).
    h = jnp.dot(w_ref[0, :, :IN_PAD], x, preferred_element_type=jnp.float32)
    h = jnp.maximum(h, 0.0)                                  # (64, tb)

    # Layers 1..4: one (64,64) x (64,tb) MXU matmul each, bias folded in.
    for li in range(1, NUM_LAYERS - 1):
        h = jnp.dot(w_ref[li], h, preferred_element_type=jnp.float32)
        h = jnp.maximum(h, 0.0)

    # Last layer: only the first 8 output rows are needed (row 0 is real).
    h_last = jnp.dot(w_ref[NUM_LAYERS - 1, 0:8, :], h,
                     preferred_element_type=jnp.float32)     # (8, tb)

    # Lane-dense (1, tb) store of the single real output feature.
    o_ref[0] = jax.nn.sigmoid(h_last[0:1, :]).astype(o_ref.dtype)


def pack_params(weights, biases):
    """weights[li]: (fan_out, fan_in) (PyTorch Linear layout), biases[li]: (fan_out,).

    Returns one (6, 64, 64) zero-padded weight stack with the bias folded in:
    the input carries a constant 1.0 at row CONST_IN, every hidden layer writes
    its bias into that constant column and regenerates constant rows [56,64)
    for the next layer (all real widths are <= 48, so no collision)."""
    w_stack = jnp.zeros((NUM_LAYERS, FEAT, FEAT), jnp.float32)
    for li, ((fan_in, fan_out), w, b) in enumerate(zip(LAYER_DIMS, weights, biases)):
        const_col = CONST_IN if li == 0 else CONST_HID
        w_stack = w_stack.at[li, :fan_out, :fan_in].set(w.astype(jnp.float32))
        w_stack = w_stack.at[li, :fan_out, const_col].set(b.astype(jnp.float32))
        if li < NUM_LAYERS - 1:
            w_stack = w_stack.at[li, CONST_HID:FEAT, const_col].set(1.0)
    return w_stack


def _choose_tile(B):
    """Batch tile: 1 tile for B<=128; otherwise >=2 tiles (v7x megacore) with a
    per-tile cap of MAX_TB (fat tiles amortize per-step cost on v5e/v6e)."""
    bp128 = _round_up(max(B, 1), 128)
    if bp128 <= 128:
        tb = 128
    else:
        tb = min(_round_up((bp128 + 1) // 2, 128), MAX_TB)
    bp = _round_up(bp128, tb)
    return tb, bp, bp // tb


def forcast_model_forward(x, w_stack):
    """x: (B, 12) float32, w_stack: (6, 64, 64) packed params -> (B, 1) float32."""
    B, in_dim = x.shape
    assert in_dim == IN_DIM
    if B == 0:
        return jnp.zeros((0, 1), jnp.float32)

    tb, bp, n_tiles = _choose_tile(B)

    # Feature-major input staged as a single fused build: 12 feature rows
    # (batch-padded), one constant-1 row, three zero rows -> (16, bp).
    xt = jnp.pad(x.T.astype(jnp.float32), ((0, 0), (0, bp - B)))
    x_t = jnp.concatenate(
        [xt,
         jnp.ones((1, bp), jnp.float32),
         jnp.zeros((IN_PAD - IN_DIM - 1, bp), jnp.float32)],
        axis=0)

    out = pl.pallas_call(
        _mlp_kernel,
        out_shape=jax.ShapeDtypeStruct((n_tiles, 1, tb), jnp.float32),
        grid_spec=pl.GridSpec(
            grid=(n_tiles,),
            in_specs=[
                pl.BlockSpec((IN_PAD, tb), lambda i: (0, i)),                 # x tile
                pl.BlockSpec((NUM_LAYERS, FEAT, FEAT), lambda i: (0, 0, 0)),  # weights (resident)
            ],
            out_specs=pl.BlockSpec((1, 1, tb), lambda i: (i, 0, 0)),          # lane-dense row
        ),
        compiler_params=pltpu.CompilerParams(
            dimension_semantics=("parallel",)),
    )(x_t, w_stack)

    return out.reshape(bp)[:B].reshape(B, 1)


def init_params(key):
    """Deterministic init mimicking nn.Linear default (uniform +-1/sqrt(fan_in)),
    kept in true (fan_out, fan_in) / (fan_out,) shapes."""
    weights, biases = [], []
    for (fan_in, fan_out) in LAYER_DIMS:
        key, kw, kb = jax.random.split(key, 3)
        bound = 1.0 / jnp.sqrt(fan_in)
        w = jax.random.uniform(kw, (fan_out, fan_in), jnp.float32, -bound, bound)
        b = jax.random.uniform(kb, (fan_out,), jnp.float32, -bound, bound)
        weights.append(w)
        biases.append(b)
    return weights, biases


def reference_forward(x, weights, biases):
    """Pure-JAX reference on the un-padded parameters."""
    h = x.astype(jnp.float32)
    for li, (w, b) in enumerate(zip(weights, biases)):
        h = h @ w.T + b
        if li < NUM_LAYERS - 1:
            h = jnp.maximum(h, 0.0)
        else:
            h = jax.nn.sigmoid(h)
    return h


if __name__ == "__main__":
    # TODO(synk): training utilities (fit/fit_batch/Adam/MSELoss/save/test) are
    # host-side PyTorch code with no Pallas equivalent; only forward() is implemented.
    key = jax.random.PRNGKey(0)
    key, kx = jax.random.split(key)

    batch = 16
    x = jax.random.normal(kx, (batch, IN_DIM), dtype=jnp.float32)

    weights, biases = init_params(key)
    w_stack = pack_params(weights, biases)

    fwd = jax.jit(forcast_model_forward)
    out = fwd(x, w_stack)
    out = jax.block_until_ready(out)

    ref = reference_forward(x, weights, biases)
    assert out.shape == (batch, 1), out.shape
    assert jnp.allclose(out, ref, atol=1e-5, rtol=1e-5), (
        float(jnp.max(jnp.abs(out - ref))))

    print("KERNEL_OK")
</pallas_src>

<mosaic_0001>
module attributes {stable_mosaic.version = 11 : i64} {
  func.func @_mlp_kernel(%arg0: i32, %arg1: memref<16x128xf32, #tpu.memory_space<vmem>>, %arg2: memref<6x64x64xf32, #tpu.memory_space<vmem>>, %arg3: memref<1x1x128xf32, #tpu.memory_space<vmem>>) attributes {dimension_semantics = [#tpu.dimension_semantics<parallel>], iteration_bounds = array<i64: 1>, scalar_prefetch = 0 : i64, scratch_operands = 0 : i64, tpu.core_type = #tpu.core_type<tc>, window_params = [{transform_indices = @transform_0, window_bounds = array<i64: 16, 128>}, {pipeline_mode = #tpu.pipeline_mode<synchronous>, transform_indices = @transform_1, window_bounds = array<i64: 6, 64, 64>}, {transform_indices = @transform_2, window_bounds = array<i64: 1, 1, 128>}]} {
    %c0 = arith.constant 0 : index
    %c0_0 = arith.constant 0 : index
    %0 = vector.load %arg1[%c0, %c0_0] : memref<16x128xf32, #tpu.memory_space<vmem>>, vector<16x128xf32>
    %c0_1 = arith.constant 0 : index
    %c0_2 = arith.constant 0 : index
    %c0_3 = arith.constant 0 : index
    %1 = vector.load %arg2[%c0_1, %c0_2, %c0_3] : memref<6x64x64xf32, #tpu.memory_space<vmem>>, vector<1x64x16xf32>
    %2 = vector.shape_cast %1 : vector<1x64x16xf32> to vector<64x16xf32>
    %cst = arith.constant dense<0.000000e+00> : vector<64x128xf32>
    %3 = tpu.matmul %2, %0, %cst {dimension_numbers = #tpu.dot_dimension_numbers<[1], [0], [0], [1], [0, 0, 1, 1], [], []>} : vector<64x16xf32>, vector<16x128xf32>, vector<64x128xf32> -> vector<64x128xf32>
    %cst_4 = arith.constant 0.000000e+00 : f32
    %4 = vector.broadcast %cst_4 : f32 to vector<64x128xf32>
    %5 = arith.maximumf %3, %4 : vector<64x128xf32>
    %c1 = arith.constant 1 : index
    %c0_5 = arith.constant 0 : index
    %c0_6 = arith.constant 0 : index
    %6 = vector.load %arg2[%c1, %c0_5, %c0_6] : memref<6x64x64xf32, #tpu.memory_space<vmem>>, vector<1x64x64xf32>
    %7 = vector.shape_cast %6 : vector<1x64x64xf32> to vector<64x64xf32>
    %cst_7 = arith.constant dense<0.000000e+00> : vector<64x128xf32>
    %8 = tpu.matmul %7, %5, %cst_7 {dimension_numbers = #tpu.dot_dimension_numbers<[1], [0], [0], [1], [0, 0, 1, 1], [], []>} : vector<64x64xf32>, vector<64x128xf32>, vector<64x128xf32> -> vector<64x128xf32>
    %cst_8 = arith.constant 0.000000e+00 : f32
    %9 = vector.broadcast %cst_8 : f32 to vector<64x128xf32>
    %10 = arith.maximumf %8, %9 : vector<64x128xf32>
    %c2 = arith.constant 2 : index
    %c0_9 = arith.constant 0 : index
    %c0_10 = arith.constant 0 : index
    %11 = vector.load %arg2[%c2, %c0_9, %c0_10] : memref<6x64x64xf32, #tpu.memory_space<vmem>>, vector<1x64x64xf32>
    %12 = vector.shape_cast %11 : vector<1x64x64xf32> to vector<64x64xf32>
    %cst_11 = arith.constant dense<0.000000e+00> : vector<64x128xf32>
    %13 = tpu.matmul %12, %10, %cst_11 {dimension_numbers = #tpu.dot_dimension_numbers<[1], [0], [0], [1], [0, 0, 1, 1], [], []>} : vector<64x64xf32>, vector<64x128xf32>, vector<64x128xf32> -> vector<64x128xf32>
    %cst_12 = arith.constant 0.000000e+00 : f32
    %14 = vector.broadcast %cst_12 : f32 to vector<64x128xf32>
    %15 = arith.maximumf %13, %14 : vector<64x128xf32>
    %c3 = arith.constant 3 : index
    %c0_13 = arith.constant 0 : index
    %c0_14 = arith.constant 0 : index
    %16 = vector.load %arg2[%c3, %c0_13, %c0_14] : memref<6x64x64xf32, #tpu.memory_space<vmem>>, vector<1x64x64xf32>
    %17 = vector.shape_cast %16 : vector<1x64x64xf32> to vector<64x64xf32>
    %cst_15 = arith.constant dense<0.000000e+00> : vector<64x128xf32>
    %18 = tpu.matmul %17, %15, %cst_15 {dimension_numbers = #tpu.dot_dimension_numbers<[1], [0], [0], [1], [0, 0, 1, 1], [], []>} : vector<64x64xf32>, vector<64x128xf32>, vector<64x128xf32> -> vector<64x128xf32>
    %cst_16 = arith.constant 0.000000e+00 : f32
    %19 = vector.broadcast %cst_16 : f32 to vector<64x128xf32>
    %20 = arith.maximumf %18, %19 : vector<64x128xf32>
    %c4 = arith.constant 4 : index
    %c0_17 = arith.constant 0 : index
    %c0_18 = arith.constant 0 : index
    %21 = vector.load %arg2[%c4, %c0_17, %c0_18] : memref<6x64x64xf32, #tpu.memory_space<vmem>>, vector<1x64x64xf32>
    %22 = vector.shape_cast %21 : vector<1x64x64xf32> to vector<64x64xf32>
    %cst_19 = arith.constant dense<0.000000e+00> : vector<64x128xf32>
    %23 = tpu.matmul %22, %20, %cst_19 {dimension_numbers = #tpu.dot_dimension_numbers<[1], [0], [0], [1], [0, 0, 1, 1], [], []>} : vector<64x64xf32>, vector<64x128xf32>, vector<64x128xf32> -> vector<64x128xf32>
    %cst_20 = arith.constant 0.000000e+00 : f32
    %24 = vector.broadcast %cst_20 : f32 to vector<64x128xf32>
    %25 = arith.maximumf %23, %24 : vector<64x128xf32>
    %c5 = arith.constant 5 : index
    %c0_21 = arith.constant 0 : index
    %c0_22 = arith.constant 0 : index
    %26 = vector.load %arg2[%c5, %c0_21, %c0_22] : memref<6x64x64xf32, #tpu.memory_space<vmem>>, vector<1x8x64xf32>
    %27 = vector.shape_cast %26 : vector<1x8x64xf32> to vector<8x64xf32>
    %cst_23 = arith.constant dense<0.000000e+00> : vector<8x128xf32>
    %28 = tpu.matmul %27, %25, %cst_23 {dimension_numbers = #tpu.dot_dimension_numbers<[1], [0], [0], [1], [0, 0, 1, 1], [], []>} : vector<8x64xf32>, vector<64x128xf32>, vector<8x128xf32> -> vector<8x128xf32>
    %29 = vector.extract_strided_slice %28 {offsets = [0, 0], sizes = [1, 128], strides = [1, 1]} : vector<8x128xf32> to vector<1x128xf32>
    %30 = arith.negf %29 : vector<1x128xf32>
    %31 = math.exp %30 : vector<1x128xf32>
    %cst_24 = arith.constant 1.000000e+00 : f32
    %32 = vector.broadcast %cst_24 : f32 to vector<1x128xf32>
    %33 = arith.addf %32, %31 : vector<1x128xf32>
    %34 = arith.divf %32, %33 : vector<1x128xf32>
    %c0_25 = arith.constant 0 : index
    %c0_26 = arith.constant 0 : index
    %c0_27 = arith.constant 0 : index
    %35 = vector.load %arg3[%c0_25, %c0_26, %c0_27] : memref<1x1x128xf32, #tpu.memory_space<vmem>>, vector<1x1x128xf32>
    %36 = vector.shape_cast %35 : vector<1x1x128xf32> to vector<1x128xf32>
    %37 = vector.shape_cast %34 : vector<1x128xf32> to vector<1x1x128xf32>
    tpu.vector_store %arg3[%c0_25, %c0_26, %c0_27], %37 {strides = array<i32>} : memref<1x1x128xf32, #tpu.memory_space<vmem>>, vector<1x1x128xf32>,
    return
  }
  func.func @transform_0(%arg0: i32) -> (i32, i32) {
    %c0_i32 = arith.constant 0 : i32
    %c0_i32_0 = arith.constant 0 : i32
    return %c0_i32, %arg0 : i32, i32
  }
  func.func @transform_1(%arg0: i32) -> (i32, i32, i32) {
    %c0_i32 = arith.constant 0 : i32
    %c0_i32_0 = arith.constant 0 : i32
    %c0_i32_1 = arith.constant 0 : i32
    %c0_i32_2 = arith.constant 0 : i32
    return %c0_i32, %c0_i32_0, %c0_i32_1 : i32, i32, i32
  }
  func.func @transform_2(%arg0: i32) -> (i32, i32, i32) {
    %c0_i32 = arith.constant 0 : i32
    %c0_i32_0 = arith.constant 0 : i32
    %c0_i32_1 = arith.constant 0 : i32
    return %arg0, %c0_i32, %c0_i32_0 : i32, i32, i32
  }
}

</mosaic_0001>

<bundles_post_ra>
// kernel: forcast_model_forward.1
= control target key start
LH: loop header
LB: loop body
LE: loop exit
PB: predicated region body
PF: predicated region fallthrough
CT: control target
= control target key end

     0   :  { %7 = vsyncpa [#allocation3], 0  ;;  %s1231_s9 = smov [#allocation2]   ;;  %s1314_s0 = inlined_call_operand.vmem [shape: f32[16,128], index: 0, kind: input, shape index: {}]   ;;  %s1315_s1 = inlined_call_operand.hbm [shape: f32[6,64,64], index: 1, kind: input, shape index: {}]   ;;  %s1316_s2 = inlined_call_operand.vmem [shape: f32[1,1,128], index: 2, kind: output, shape index: {}]  }
   0x1   :  { %s15_s10 = sshll.u32 %s1231_s9, 4  ;;  %s1207_s13 = scalar_lea.hbm %s1315_s1, 6144  ;;  %s16_s10 = int_to_ptr.vmem [resolvable:$true] %s15_s10 }
   0x2   :  { %p1208_p0 = scmp.ne.s32.totalorder %s1315_s1, %s1207_s13  ;;  %p1211_p1 = scmp.lt.u32.totalorder %s1207_s13, %s1315_s1 }
   0x4   :  { %p1213_p2 = pnand %p1211_p1, %p1208_p0 }
   0x6   :  { %1216 = shalt.err (!%p1213_p2)
}
   0x7   :  { %s1217_s18 = scalar_lea.vmem %s16_s10, 6144  ;;  %p1222_p4 = scmp.lt.s32.totalorder %s16_s10, %s16_s10 }
   0x8   :  { %p1218_p3 = scmp.ne.s32.totalorder %s16_s10, %s1217_s18  ;;  %p1223_p5 = scmp.lt.s32.totalorder %s1217_s18, %s1217_s18 }
   0xa   :  { %p1224_p6 = por %p1223_p5, %p1222_p4 }
   0xc   :  { %p1225_p7 = pnand %p1224_p6, %p1218_p3 }
   0xe   :  { %1228 = shalt.err (!%p1225_p7)
}
   0xf   :  { %s1232_s19 = smov 128   ;;  %s1233_s20 = smov 8  }
  0x10   :  { %21 = dma.hbm_to_vmem [thread:$0]  %s1315_s1, 6144, %s16_s10, [#allocation3], %s1232_s19, %s1232_s19, %s1233_s20  }
  0x11   :  { %1229 = dma.done.wait [#allocation3], 6144  }
  0x12   :  { %1230 = vsyncadd [#allocation3], 4294961152  ;;  %vm35_vm0 = vcmask 130048   ;;  %v25_v0 = vld [vmem:[%s1314_s0] sm:$0xff]  ;;  %v26_v1 = vld [vmem:[%s1314_s0 + $0x8] sm:$0xff]  ;;  %vm182_vm1 = vcmask 523264  }
  0x13   :  { %v27_v2 = vld [vmem:[#allocation2] sm:$0xff]  ;;  %v1117_v3 = vpack.c.bf16 %v26_v1, %v25_v0  ;;  %v28_v4 = vld [vmem:[#allocation2 + $0x8] sm:$0xff]  ;;  %v29_v5 = vld [vmem:[#allocation2 + $0x10] sm:$0xff]  ;;  %vm1235_vm2 = vmmov 0  }
  0x14   :  { %974 = vmatprep.mubr.msk.f32.mxu0 %vm35_vm0, %v27_v2  ;;  %v30_v6 = vld [vmem:[#allocation2 + $0x18] sm:$0xff]  ;;  %v31_v7 = vld [vmem:[#allocation2 + $0x20] sm:$0xff]  ;;  %v32_v8 = vld [vmem:[#allocation2 + $0x28] sm:$0xff] }
  0x15   :  { %1118 = vmatprep.subr.bf16.mxu0 %v1117_v3  ;;  %v33_v9 = vld [vmem:[#allocation2 + $0x30] sm:$0xff]  ;;  %v34_v10 = vld [vmem:[#allocation2 + $0x38] sm:$0xff]  ;;  %v174_v11 = vld [vmem:[#allocation2 + $0x40] sm:$0xff] }
  0x16   :  { %1120 = vmatpush3.bf16.msra.mxu0 %v1117_v3  ;;  %1002 = vmatprep.mubr.msk.f32.mxu1 %vm182_vm1, %v174_v11  ;;  %v175_v32 = vld [vmem:[#allocation2 + $0x48] sm:$0xff]  ;;  %v176_v33 = vld [vmem:[#allocation2 + $0x50] sm:$0xff]  ;;  %v177_v34 = vld [vmem:[#allocation2 + $0x58] sm:$0xff] }
  0x17   :  { %v178_v35 = vld [vmem:[#allocation2 + $0x60] sm:$0xff]  ;;  %v179_v36 = vld [vmem:[#allocation2 + $0x68] sm:$0xff]  ;;  %v180_v37 = vld [vmem:[#allocation2 + $0x70] sm:$0xff] }
  0x18   :  { %v181_v38 = vld [vmem:[#allocation2 + $0x78] sm:$0xff]  ;;  %v321_v39 = vld [vmem:[#allocation2 + $0x80] sm:$0xff]  ;;  %v322_v60 = vld [vmem:[#allocation2 + $0x88] sm:$0xff] }
  0x19   :  { %975 = vmatmul.mubr.msk.f32.vlgmr.msra.gmra.mrb[0].mxu0 %vm35_vm0, %v28_v4  ;;  %v323_v61 = vld [vmem:[#allocation2 + $0x90] sm:$0xff]  ;;  %v324_v62 = vld [vmem:[#allocation2 + $0x98] sm:$0xff]  ;;  %v325_v63 = vld [vmem:[#allocation2 + $0xa0] sm:$0xff] }
  0x1a   :  { %977 = vmatprep.mubr.msk.f32.mxu0 %vm35_vm0, %v29_v5  ;;  %v326_v0 = vld [vmem:[#allocation2 + $0xa8] sm:$0xff]  ;;  %v327_v1 = vld [vmem:[#allocation2 + $0xb0] sm:$0xff]  ;;  %v328_v2 = vld [vmem:[#allocation2 + $0xb8] sm:$0xff] }
  0x1b   :  { %v467_v3 = vld [vmem:[#allocation2 + $0xc0] sm:$0xff] }
  0x1d   :  { %978 = vmatmul.mubr.msk.f32.gmra.mrb[2].mxu0 %vm35_vm0, %v30_v6 }
  0x1e   :  { %980 = vmatprep.mubr.msk.f32.mxu0 %vm35_vm0, %v31_v7 }
  0x21   :  { %981 = vmatmul.mubr.msk.f32.gmra.mrb[4].mxu0 %vm35_vm0, %v32_v8 }
  0x22   :  { %983 = vmatprep.mubr.msk.f32.mxu0 %vm35_vm0, %v33_v9 }
  0x25   :  { %984 = vmatmul.mubr.msk.f32.gmra.mrb[6].mxu0 %vm35_vm0, %v34_v10 }
  0x26   :  { %1030 = vmatprep.mubr.msk.f32.mxu0 %vm182_vm1, %v321_v39 }
  0xec   :  { %v976_v12 = vpop.f32.mrb[0].mxu0 }
  0xed   :  { %v166_v13 = vmax.f32 %v976_v12, 0.0  ;;  %v126_v14 = vpop.f32.mrb[1].mxu0 }
  0xee   :  { %v165_v15 = vmax.f32 %v126_v14, 0.0 }
  0xf0   :  { %v979_v16 = vpop.f32.mrb[2].mxu0  ;;  %v1121_v17 = vpack.c.bf16 %v166_v13, %v165_v15 }
  0xf1   :  { %v168_v18 = vmax.f32 %v979_v16, 0.0  ;;  %v136_v19 = vpop.f32.mrb[3].mxu0 }
  0xf2   :  { %v167_v20 = vmax.f32 %v136_v19, 0.0  ;;  %1122 = vmatprep.subr.bf16.mxu1 %v1121_v17 }
  0xf3   :  { %1124 = vmatpush3.bf16.msra.mxu1 %v1121_v17 }
  0xf4   :  { %v1125_v21 = vpack.c.bf16 %v168_v18, %v167_v20  ;;  %v982_v22 = vpop.f32.mrb[4].mxu0 }
  0xf5   :  { %v170_v23 = vmax.f32 %v982_v22, 0.0  ;;  %v146_v24 = vpop.f32.mrb[5].mxu0 }
  0xf6   :  { %v169_v25 = vmax.f32 %v146_v24, 0.0  ;;  %1126 = vmatprep.subr.bf16.mxu1 %v1125_v21  ;;  %v468_v24 = vld [vmem:[#allocation2 + $0xc8] sm:$0xff] }
  0xf7   :  { %1128 = vmatpush3.bf16.msra.mxu1 %v1125_v21 }
  0xf8   :  { %v1129_v26 = vpack.c.bf16 %v170_v23, %v169_v25  ;;  %v985_v27 = vpop.f32.mrb[6].mxu0  ;;  %v469_v25 = vld [vmem:[#allocation2 + $0xd0] sm:$0xff] }
  0xf9   :  { %v172_v28 = vmax.f32 %v985_v27, 0.0  ;;  %v156_v29 = vpop.f32.mrb[7].mxu0  ;;  %v471_v27 = vld [vmem:[#allocation2 + $0xe0] sm:$0xff] }
  0xfa   :  { %v171_v30 = vmax.f32 %v156_v29, 0.0  ;;  %1130 = vmatprep.subr.bf16.mxu1 %v1129_v26  ;;  %v473_v29 = vld [vmem:[#allocation2 + $0xf0] sm:$0xff] }
  0xfb   :  { %1132 = vmatpush3.bf16.msra.mxu1 %v1129_v26  ;;  %v470_v26 = vld [vmem:[#allocation2 + $0xd8] sm:$0xff] }
  0xfc   :  { %v1133_v31 = vpack.c.bf16 %v172_v28, %v171_v30  ;;  %v472_v28 = vld [vmem:[#allocation2 + $0xe8] sm:$0xff]  ;;  %v474_v30 = vld [vmem:[#allocation2 + $0xf8] sm:$0xff] }
  0xfe   :  { %1134 = vmatprep.subr.bf16.mxu1 %v1133_v31 }
  0xff   :  { %1136 = vmatpush3.bf16.msra.mxu1 %v1133_v31  ;;  %v613_v31 = vld [vmem:[#allocation2 + $0x100] sm:$0xff] }
 0x102   :  { %1003 = vmatmul.mubr.msk.f32.vlgmr.msra.gmra.mrb[0].mxu1 %vm182_vm1, %v175_v32 }
 0x103   :  { %1005 = vmatprep.mubr.msk.f32.mxu1 %vm182_vm1, %v176_v33 }
 0x106   :  { %1006 = vmatmul.mubr.msk.f32.gmra.mrb[2].mxu1 %vm182_vm1, %v177_v34 }
 0x107   :  { %1008 = vmatprep.mubr.msk.f32.mxu1 %vm182_vm1, %v178_v35 }
 0x10a   :  { %1009 = vmatmul.mubr.msk.f32.gmra.mrb[4].mxu1 %vm182_vm1, %v179_v36 }
 0x10b   :  { %1011 = vmatprep.mubr.msk.f32.mxu1 %vm182_vm1, %v180_v37 }
 0x10e   :  { %1012 = vmatmul.mubr.msk.f32.gmra.mrb[6].mxu1 %vm182_vm1, %v181_v38 }
 0x10f   :  { %1058 = vmatprep.mubr.msk.f32.mxu1 %vm182_vm1, %v467_v3 }
 0x1d5   :  { %v1004_v40 = vpop.f32.mrb[0].mxu1 }
 0x1d6   :  { %v313_v41 = vmax.f32 %v1004_v40, 0.0  ;;  %v273_v42 = vpop.f32.mrb[1].mxu1 }
 0x1d7   :  { %v312_v43 = vmax.f32 %v273_v42, 0.0 }
 0x1d9   :  { %v1137_v44 = vpack.c.bf16 %v313_v41, %v312_v43  ;;  %v1007_v45 = vpop.f32.mrb[2].mxu1 }
 0x1da   :  { %v315_v46 = vmax.f32 %v1007_v45, 0.0  ;;  %v283_v47 = vpop.f32.mrb[3].mxu1 }
 0x1db   :  { %v314_v48 = vmax.f32 %v283_v47, 0.0  ;;  %1138 = vmatprep.subr.bf16.mxu0 %v1137_v44 }
 0x1dc   :  { %1140 = vmatpush3.bf16.msra.mxu0 %v1137_v44 }
 0x1dd   :  { %v1141_v49 = vpack.c.bf16 %v315_v46, %v314_v48  ;;  %v1010_v50 = vpop.f32.mrb[4].mxu1 }
 0x1de   :  { %v317_v51 = vmax.f32 %v1010_v50, 0.0  ;;  %v293_v52 = vpop.f32.mrb[5].mxu1 }
 0x1df   :  { %v316_v53 = vmax.f32 %v293_v52, 0.0  ;;  %1142 = vmatprep.subr.bf16.mxu0 %v1141_v49  ;;  %v614_v52 = vld [vmem:[#allocation2 + $0x108] sm:$0xff] }
 0x1e0   :  { %1144 = vmatpush3.bf16.msra.mxu0 %v1141_v49 }
 0x1e1   :  { %v1145_v54 = vpack.c.bf16 %v317_v51, %v316_v53  ;;  %v1013_v55 = vpop.f32.mrb[6].mxu1  ;;  %v615_v53 = vld [vmem:[#allocation2 + $0x110] sm:$0xff] }
 0x1e2   :  { %v319_v56 = vmax.f32 %v1013_v55, 0.0  ;;  %v303_v57 = vpop.f32.mrb[7].mxu1  ;;  %v617_v55 = vld [vmem:[#allocation2 + $0x120] sm:$0xff] }
 0x1e3   :  { %v318_v58 = vmax.f32 %v303_v57, 0.0  ;;  %1146 = vmatprep.subr.bf16.mxu0 %v1145_v54  ;;  %v619_v57 = vld [vmem:[#allocation2 + $0x130] sm:$0xff] }
 0x1e4   :  { %1148 = vmatpush3.bf16.msra.mxu0 %v1145_v54  ;;  %v616_v54 = vld [vmem:[#allocation2 + $0x118] sm:$0xff] }
 0x1e5   :  { %v1149_v59 = vpack.c.bf16 %v319_v56, %v318_v58  ;;  %v618_v56 = vld [vmem:[#allocation2 + $0x128] sm:$0xff]  ;;  %v620_v58 = vld [vmem:[#allocation2 + $0x138] sm:$0xff] }
 0x1e7   :  { %1150 = vmatprep.subr.bf16.mxu0 %v1149_v59 }
 0x1e8   :  { %1152 = vmatpush3.bf16.msra.mxu0 %v1149_v59  ;;  %v1234_v59 = vmov 0.0|0.0  }
 0x1eb   :  { %1031 = vmatmul.mubr.msk.f32.vlgmr.msra.gmra.mrb[8].mxu0 %vm182_vm1, %v322_v60  ;;  %v1236_v60 = vmov 0.0  }
 0x1ec   :  { %1033 = vmatprep.mubr.msk.f32.mxu0 %vm182_vm1, %v323_v61 }
 0x1ef   :  { %1034 = vmatmul.mubr.msk.f32.gmra.mrb[10].mxu0 %vm182_vm1, %v324_v62 }
 0x1f0   :  { %1036 = vmatprep.mubr.msk.f32.mxu0 %vm182_vm1, %v325_v63 }
 0x1f3   :  { %1037 = vmatmul.mubr.msk.f32.gmra.mrb[12].mxu0 %vm182_vm1, %v326_v0 }
 0x1f4   :  { %1039 = vmatprep.mubr.msk.f32.mxu0 %vm182_vm1, %v327_v1 }
 0x1f7   :  { %1040 = vmatmul.mubr.msk.f32.gmra.mrb[14].mxu0 %vm182_vm1, %v328_v2 }
 0x1f8   :  { %1086 = vmatprep.mubr.msk.f32.mxu0 %vm182_vm1, %v613_v31 }
 0x2be   :  { %v1032_v4 = vpop.f32.mrb[8].mxu0 }
 0x2bf   :  { %v459_v5 = vmax.f32 %v1032_v4, 0.0  ;;  %v419_v6 = vpop.f32.mrb[9].mxu0 }
 0x2c0   :  { %v458_v7 = vmax.f32 %v419_v6, 0.0 }
 0x2c2   :  { %v1153_v8 = vpack.c.bf16 %v459_v5, %v458_v7  ;;  %v1035_v9 = vpop.f32.mrb[10].mxu0 }
 0x2c3   :  { %v461_v10 = vmax.f32 %v1035_v9, 0.0  ;;  %v429_v11 = vpop.f32.mrb[11].mxu0 }
 0x2c4   :  { %v460_v12 = vmax.f32 %v429_v11, 0.0  ;;  %1154 = vmatprep.subr.bf16.mxu1 %v1153_v8 }
 0x2c5   :  { %1156 = vmatpush3.bf16.msra.mxu1 %v1153_v8 }
 0x2c6   :  { %v1157_v13 = vpack.c.bf16 %v461_v10, %v460_v12  ;;  %v1038_v14 = vpop.f32.mrb[12].mxu0 }
 0x2c7   :  { %v463_v15 = vmax.f32 %v1038_v14, 0.0  ;;  %v439_v16 = vpop.f32.mrb[13].mxu0 }
 0x2c8   :  { %v462_v17 = vmax.f32 %v439_v16, 0.0  ;;  %1158 = vmatprep.subr.bf16.mxu1 %v1157_v13 }
 0x2c9   :  { %1160 = vmatpush3.bf16.msra.mxu1 %v1157_v13 }
 0x2ca   :  { %v1161_v18 = vpack.c.bf16 %v463_v15, %v462_v17  ;;  %v1041_v19 = vpop.f32.mrb[14].mxu0  ;;  %v759_v17 = vld [vmem:[#allocation2 + $0x140] sm:$0xff] }
 0x2cb   :  { %v465_v20 = vmax.f32 %v1041_v19, 0.0  ;;  %v449_v21 = vpop.f32.mrb[15].mxu0 }
 0x2cc   :  { %v464_v22 = vmax.f32 %v449_v21, 0.0  ;;  %1162 = vmatprep.subr.bf16.mxu1 %v1161_v18 }
 0x2cd   :  { %1164 = vmatpush3.bf16.msra.mxu1 %v1161_v18 }
 0x2ce   :  { %v1165_v23 = vpack.c.bf16 %v465_v20, %v464_v22 }
 0x2d0   :  { %1166 = vmatprep.subr.bf16.mxu1 %v1165_v23 }
 0x2d1   :  { %1168 = vmatpush3.bf16.msra.mxu1 %v1165_v23 }
 0x2d2   :  { %1185 = vmatprep.subr.bf16.mxu1 %v1234_v59 }
 0x2d4   :  { %1059 = vmatmul.mubr.msk.f32.vlgmr.msra.gmra.mrb[8].mxu1 %vm182_vm1, %v468_v24 }
 0x2d5   :  { %1061 = vmatprep.mubr.msk.f32.mxu1 %vm182_vm1, %v469_v25 }
 0x2d8   :  { %1062 = vmatmul.mubr.msk.f32.gmra.mrb[10].mxu1 %vm182_vm1, %v470_v26 }
 0x2d9   :  { %1064 = vmatprep.mubr.msk.f32.mxu1 %vm182_vm1, %v471_v27 }
 0x2dc   :  { %1065 = vmatmul.mubr.msk.f32.gmra.mrb[12].mxu1 %vm182_vm1, %v472_v28 }
 0x2dd   :  { %1067 = vmatprep.mubr.msk.f32.mxu1 %vm182_vm1, %v473_v29 }
 0x2e0   :  { %1068 = vmatmul.mubr.msk.f32.gmra.mrb[14].mxu1 %vm182_vm1, %v474_v30 }
 0x2e1   :  { %1114 = vmatprep.mubr.msk.f32.mxu1 %vm1235_vm2, %v1236_v60 }
 0x3a7   :  { %v1060_v32 = vpop.f32.mrb[8].mxu1 }
 0x3a8   :  { %v605_v33 = vmax.f32 %v1060_v32, 0.0  ;;  %v565_v34 = vpop.f32.mrb[9].mxu1 }
 0x3a9   :  { %v604_v35 = vmax.f32 %v565_v34, 0.0 }
 0x3ab   :  { %v1169_v36 = vpack.c.bf16 %v605_v33, %v604_v35  ;;  %v1063_v37 = vpop.f32.mrb[10].mxu1 }
 0x3ac   :  { %v607_v38 = vmax.f32 %v1063_v37, 0.0  ;;  %v575_v39 = vpop.f32.mrb[11].mxu1 }
 0x3ad   :  { %v606_v40 = vmax.f32 %v575_v39, 0.0  ;;  %1170 = vmatprep.subr.bf16.mxu0 %v1169_v36 }
 0x3ae   :  { %1172 = vmatpush3.bf16.msra.mxu0 %v1169_v36 }
 0x3af   :  { %v1173_v41 = vpack.c.bf16 %v607_v38, %v606_v40  ;;  %v1066_v42 = vpop.f32.mrb[12].mxu1 }
 0x3b0   :  { %v609_v43 = vmax.f32 %v1066_v42, 0.0  ;;  %v585_v44 = vpop.f32.mrb[13].mxu1 }
 0x3b1   :  { %v608_v45 = vmax.f32 %v585_v44, 0.0  ;;  %1174 = vmatprep.subr.bf16.mxu0 %v1173_v41 }
 0x3b2   :  { %1176 = vmatpush3.bf16.msra.mxu0 %v1173_v41 }
 0x3b3   :  { %v1177_v46 = vpack.c.bf16 %v609_v43, %v608_v45  ;;  %v1069_v47 = vpop.f32.mrb[14].mxu1 }
 0x3b4   :  { %v611_v48 = vmax.f32 %v1069_v47, 0.0  ;;  %v595_v49 = vpop.f32.mrb[15].mxu1 }
 0x3b5   :  { %v610_v50 = vmax.f32 %v595_v49, 0.0  ;;  %1178 = vmatprep.subr.bf16.mxu0 %v1177_v46 }
 0x3b6   :  { %1180 = vmatpush3.bf16.msra.mxu0 %v1177_v46 }
 0x3b7   :  { %v1181_v51 = vpack.c.bf16 %v611_v48, %v610_v50 }
 0x3b9   :  { %1182 = vmatprep.subr.bf16.mxu0 %v1181_v51 }
 0x3ba   :  { %1184 = vmatpush3.bf16.msra.mxu0 %v1181_v51 }
 0x3bd   :  { %1087 = vmatmul.mubr.msk.f32.vlgmr.msra.gmra.mrb[16].mxu0 %vm182_vm1, %v614_v52 }
 0x3be   :  { %1089 = vmatprep.mubr.msk.f32.mxu0 %vm182_vm1, %v615_v53 }
 0x3c1   :  { %1090 = vmatmul.mubr.msk.f32.gmra.mrb[18].mxu0 %vm182_vm1, %v616_v54 }
 0x3c2   :  { %1092 = vmatprep.mubr.msk.f32.mxu0 %vm182_vm1, %v617_v55 }
 0x3c5   :  { %1093 = vmatmul.mubr.msk.f32.gmra.mrb[20].mxu0 %vm182_vm1, %v618_v56 }
 0x3c6   :  { %1095 = vmatprep.mubr.msk.f32.mxu0 %vm182_vm1, %v619_v57 }
 0x3c9   :  { %1096 = vmatmul.mubr.msk.f32.gmra.mrb[22].mxu0 %vm182_vm1, %v620_v58 }
 0x490   :  { %v1088_v61 = vpop.f32.mrb[16].mxu0 }
 0x491   :  { %v751_v62 = vmax.f32 %v1088_v61, 0.0  ;;  %v711_v63 = vpop.f32.mrb[17].mxu0 }
 0x492   :  { %v750_v0 = vmax.f32 %v711_v63, 0.0 }
 0x494   :  { %v1186_v1 = vpack.c.bf16 %v751_v62, %v750_v0  ;;  %v1091_v2 = vpop.f32.mrb[18].mxu0 }
 0x495   :  { %v753_v3 = vmax.f32 %v1091_v2, 0.0  ;;  %v721_v4 = vpop.f32.mrb[19].mxu0 }
 0x496   :  { %v752_v5 = vmax.f32 %v721_v4, 0.0  ;;  %1187 = vmatpush3.bf16.msra.mxu1 %v1186_v1 }
 0x497   :  { %1188 = vmatprep.subr.bf16.mxu1 %v1234_v59 }
 0x498   :  { %v1189_v6 = vpack.c.bf16 %v753_v3, %v752_v5  ;;  %v1094_v7 = vpop.f32.mrb[20].mxu0 }
 0x499   :  { %v755_v8 = vmax.f32 %v1094_v7, 0.0  ;;  %v731_v9 = vpop.f32.mrb[21].mxu0 }
 0x49a   :  { %v754_v10 = vmax.f32 %v731_v9, 0.0  ;;  %1190 = vmatpush3.bf16.msra.mxu1 %v1189_v6 }
 0x49b   :  { %1191 = vmatprep.subr.bf16.mxu1 %v1234_v59 }
 0x49c   :  { %v1192_v11 = vpack.c.bf16 %v755_v8, %v754_v10  ;;  %v1097_v12 = vpop.f32.mrb[22].mxu0 }
 0x49d   :  { %v757_v13 = vmax.f32 %v1097_v12, 0.0  ;;  %v741_v14 = vpop.f32.mrb[23].mxu0 }
 0x49e   :  { %v756_v15 = vmax.f32 %v741_v14, 0.0  ;;  %1193 = vmatpush3.bf16.msra.mxu1 %v1192_v11 }
 0x49f   :  { %1194 = vmatprep.subr.bf16.mxu1 %v1234_v59 }
 0x4a0   :  { %v1195_v16 = vpack.c.bf16 %v757_v13, %v756_v15 }
 0x4a2   :  { %1196 = vmatpush3.bf16.msra.mxu1 %v1195_v16 }
 0x4a5   :  { %1115 = vmatmul.mubr.msk.f32.vlgmr.msra.gmra.mrb[16].mxu1 %vm182_vm1, %v759_v17 }
 0x578   :  { %v829_v18 = vpop.f32.mrb[16].mxu1 }
 0x579   :  { %v886_v19 = vmul.f32 -1.442695, %v829_v18  ;;  %v1116_v20 = vpop.f32.mrb[17].mxu1 }
 0x57b   :  { %1203 = vpow2.f32 %v886_v19 }
 0x585   :  { %v1204_v21 = vpop.eup %1203 }
 0x586   :  { %v836_v22 = vadd.f32 1.0, %v1204_v21 }
 0x588   :  { %1205 = vrcp.f32 %v836_v22 }
 0x592   :  { %v1206_v23 = vpop.eup %1205 }
 0x593   :  { %839 = vst [vmem:[%s1316_s2] sm:$0x1] %v1206_v23 }
 0x594   :  { %844 = vsyncpa [#allocation3], 1 }

</bundles_post_ra>
